<compile_context>
chip_gen: v5e
topology: v5e:2x2
jax: 0.10.0
libtpu: 0.0.40
codegen_flags: <defaults>
</compile_context>

<pallas_src>
import jax
import jax.numpy as jnp
import numpy as np
from jax.experimental import pallas as pl
from jax.experimental.pallas import tpu as pltpu


def attention_kernel(x4_ref, sh_ref, w4_ref, wref_ref, qb_ref, bref_ref, v_ref,
                     e_ref, u_ref):
    # Layout inside the kernel: hidden H on sublanes, nodes N on lanes.
    #   x4_ref : (1, 4H, TN)  concatenated [d; d_rem; dist; ch_l] (bf16)
    #   sh_ref : (1,  H, TN)  static_hidden                        (bf16)
    #   w4_ref : (H, 4H)      stacked [w_d | w_d_rem | w_dist | w_ch_l] (bf16)
    #   wref_ref:(H,  H)      w_ref                                 (bf16)
    #   qb_ref : (1, H, 1)    project_query(decoder) + sum of 4 fused biases (f32)
    #   bref_ref:(H, 1), v_ref:(H, 1)                               (f32)

    # Fused feature projection: one K=4H matmul instead of four K=H matmuls.
    feat = jnp.dot(w4_ref[...], x4_ref[0], preferred_element_type=jnp.float32)   # (H, TN) f32

    # e projection kept separate (e is a module output); bias added in f32.
    e = jnp.dot(wref_ref[...], sh_ref[0],
                preferred_element_type=jnp.float32) + bref_ref[...]              # (H, TN) f32

    # q (+ fused biases) broadcast over the node/lane axis; tanh on the EUP in f32.
    s = jnp.tanh(e + feat + qb_ref[0])                                           # (H, TN) f32

    # logits: VPU multiply + sublane reduction -> lane-dense (1, TN) row.
    u = jnp.sum(s * v_ref[...], axis=0, keepdims=True)                           # (1, TN) f32

    e_ref[0] = e.astype(e_ref.dtype)
    u_ref[0] = u.astype(u_ref.dtype)


def attention_forward(params, static_hidden, static_ch_l, dynamic_hidden,
                      decoder_hidden, use_tahn=False, C=10.0,
                      compute_dtype=jnp.bfloat16, n_tile=None):
    """static_hidden/static_ch_l/dynamic_hidden[*]: (B, H, N); decoder_hidden: (B, H).
    Returns (e, logits) with e: (B, H, N), logits: (B, N) — same as the PyTorch module."""
    d, d_rem, dist = dynamic_hidden
    B, H, N = static_hidden.shape
    f32 = jnp.float32

    # --- wrapper-side preparation (cheap XLA ops, no layout transposes) -------
    # Fused inputs along the channel axis -> (B, 4H, N); cast to MXU dtype.
    x4 = jnp.concatenate([d, d_rem, dist, static_ch_l], axis=1).astype(compute_dtype)
    sh = static_hidden.astype(compute_dtype)

    # Stacked weight (H, 4H) matching the row order of x4; e-projection weight.
    w4 = jnp.concatenate(
        [params["w_d"], params["w_d_rem"], params["w_dist"], params["w_ch_l"]],
        axis=1).astype(compute_dtype)
    wref = jnp.asarray(params["w_ref"], compute_dtype)

    # project_query computed here (single-row matmul wastes MXU rows in-kernel);
    # its bias plus the four fused-projection biases are folded into one column.
    bias4 = (params["b_d"] + params["b_d_rem"] + params["b_dist"] + params["b_ch_l"]).astype(f32)
    q = (decoder_hidden.astype(f32) @ jnp.asarray(params["w_q"], f32).T
         + jnp.asarray(params["b_q"], f32))                                   # (B, H)
    qb = (q + bias4[None, :]).reshape(B, H, 1).astype(f32)                    # (B, H, 1)

    bref = jnp.asarray(params["b_ref"], f32).reshape(H, 1)
    v = jnp.asarray(params["v"], f32).reshape(H, 1)

    # --- node tiling ----------------------------------------------------------
    if n_tile is None:
        n_tile = N if N <= 1024 else 1024   # multiple of 128 when actually tiling
    n_tile = min(n_tile, N)
    nt = pl.cdiv(N, n_tile)
    grid = (B, nt)

    in_specs = [
        pl.BlockSpec((1, 4 * H, n_tile), lambda b, n: (b, 0, n)),   # x4
        pl.BlockSpec((1, H, n_tile),     lambda b, n: (b, 0, n)),   # static_hidden
        pl.BlockSpec((H, 4 * H),         lambda b, n: (0, 0)),      # stacked weights (resident)
        pl.BlockSpec((H, H),             lambda b, n: (0, 0)),      # w_ref (resident)
        pl.BlockSpec((1, H, 1),          lambda b, n: (b, 0, 0)),   # qb (per batch)
        pl.BlockSpec((H, 1),             lambda b, n: (0, 0)),      # b_ref
        pl.BlockSpec((H, 1),             lambda b, n: (0, 0)),      # v
    ]
    out_specs = (
        pl.BlockSpec((1, H, n_tile), lambda b, n: (b, 0, n)),       # e in (B, H, N) layout
        pl.BlockSpec((1, 1, n_tile), lambda b, n: (b, 0, n)),       # logits, lane-dense
    )
    out_shape = (
        jax.ShapeDtypeStruct((B, H, N), f32),
        jax.ShapeDtypeStruct((B, 1, N), f32),
    )

    e, u = pl.pallas_call(
        attention_kernel,
        grid=grid,
        in_specs=in_specs,
        out_specs=out_specs,
        out_shape=out_shape,
        compiler_params=pltpu.CompilerParams(
            dimension_semantics=("parallel", "parallel"),
            vmem_limit_bytes=32 * 1024 * 1024,
        ),
    )(x4, sh, w4, wref, qb, bref, v)

    logits = u[:, 0, :]                     # (B, N)
    if use_tahn:
        logits = C * jnp.tanh(logits)
    return e, logits


def make_params(key, H):
    ks = jax.random.split(key, 13)
    n = lambda k, shape: (jax.random.normal(k, shape, jnp.float32) * 0.1)
    # Conv1d(kernel_size=1) weights stored as (out, in); Linear weight as (out, in).
    # NOTE: torch inits self.v to zeros; we use small random values so the output
    # reduction is non-trivial (deterministic via PRNGKey).
    return {
        "w_d": n(ks[0], (H, H)),     "b_d": n(ks[1], (H,)),
        "w_d_rem": n(ks[2], (H, H)), "b_d_rem": n(ks[3], (H,)),
        "w_dist": n(ks[4], (H, H)),  "b_dist": n(ks[5], (H,)),
        "w_ch_l": n(ks[6], (H, H)),  "b_ch_l": n(ks[7], (H,)),
        "w_ref": n(ks[8], (H, H)),   "b_ref": n(ks[9], (H,)),
        "w_q": n(ks[10], (H, H)),    "b_q": n(ks[11], (H,)),
        "v": n(ks[12], (1, 1, H)),
    }


def reference_forward(params, static_hidden, static_ch_l, dynamic_hidden, decoder_hidden):
    """Pure-JAX reference mirroring the PyTorch forward (use_tahn=False)."""
    d, d_rem, dist = dynamic_hidden
    conv1 = lambda x, w, b: jnp.einsum("oi,bin->bon", w, x) + b[None, :, None]
    d_ex = conv1(d, params["w_d"], params["b_d"])
    d_rm = conv1(d_rem, params["w_d_rem"], params["b_d_rem"])
    dst  = conv1(dist, params["w_dist"], params["b_dist"])
    ch_l = conv1(static_ch_l, params["w_ch_l"], params["b_ch_l"])
    e    = conv1(static_hidden, params["w_ref"], params["b_ref"])
    dec  = decoder_hidden @ params["w_q"].T + params["b_q"]          # (B, H)
    q    = dec[:, :, None]                                           # broadcast over N
    v    = params["v"][0, 0]                                         # (H,)
    u    = jnp.einsum("h,bhn->bn", v, jnp.tanh(e + q + d_ex + d_rm + ch_l + dst))
    return e, u


if __name__ == "__main__":
    B, H, N = 2, 32, 16
    key = jax.random.PRNGKey(0)
    kp, k1, k2, k3, k4, k5, k6 = jax.random.split(key, 7)

    params = make_params(kp, H)
    static_hidden = jax.random.normal(k1, (B, H, N), jnp.float32)
    static_ch_l   = jax.random.normal(k2, (B, H, N), jnp.float32)
    d             = jax.random.normal(k3, (B, H, N), jnp.float32)
    d_rem         = jax.random.normal(k4, (B, H, N), jnp.float32)
    dist          = jax.random.normal(k5, (B, H, N), jnp.float32)
    decoder_hidden = jax.random.normal(k6, (B, H), jnp.float32)

    e_ref, logits_ref = reference_forward(params, static_hidden, static_ch_l,
                                          (d, d_rem, dist), decoder_hidden)

    # bf16 MXU path (default): f32 accumulate, looser tolerance.
    e, logits = attention_forward(params, static_hidden, static_ch_l,
                                  (d, d_rem, dist), decoder_hidden)
    jax.block_until_ready((e, logits))
    assert e.shape == (B, H, N) and logits.shape == (B, N)
    np.testing.assert_allclose(np.asarray(e), np.asarray(e_ref), rtol=3e-2, atol=3e-2)
    np.testing.assert_allclose(np.asarray(logits), np.asarray(logits_ref), rtol=3e-2, atol=3e-2)

    # f32 path: tight tolerance sanity check of the kernel structure.
    e32, logits32 = attention_forward(params, static_hidden, static_ch_l,
                                      (d, d_rem, dist), decoder_hidden,
                                      compute_dtype=jnp.float32)
    jax.block_until_ready((e32, logits32))
    np.testing.assert_allclose(np.asarray(e32), np.asarray(e_ref), rtol=1e-3, atol=1e-3)
    np.testing.assert_allclose(np.asarray(logits32), np.asarray(logits_ref), rtol=1e-3, atol=1e-3)

    print("KERNEL_OK")
</pallas_src>

<mosaic_0001>
module attributes {stable_mosaic.version = 11 : i64} {
  func.func @attention_kernel(%arg0: i32, %arg1: i32, %arg2: memref<1x128x16xbf16, #tpu.memory_space<vmem>>, %arg3: memref<1x32x16xbf16, #tpu.memory_space<vmem>>, %arg4: memref<32x128xbf16, #tpu.memory_space<vmem>>, %arg5: memref<32x32xbf16, #tpu.memory_space<vmem>>, %arg6: memref<1x32x1xf32, #tpu.memory_space<vmem>>, %arg7: memref<32x1xf32, #tpu.memory_space<vmem>>, %arg8: memref<32x1xf32, #tpu.memory_space<vmem>>, %arg9: memref<1x32x16xf32, #tpu.memory_space<vmem>>, %arg10: memref<1x1x16xf32, #tpu.memory_space<vmem>>) attributes {dimension_semantics = [#tpu.dimension_semantics<parallel>, #tpu.dimension_semantics<parallel>], iteration_bounds = array<i64: 2, 1>, scalar_prefetch = 0 : i64, scratch_operands = 0 : i64, tpu.core_type = #tpu.core_type<tc>, window_params = [{transform_indices = @transform_0, window_bounds = array<i64: 1, 128, 16>}, {transform_indices = @transform_1, window_bounds = array<i64: 1, 32, 16>}, {pipeline_mode = #tpu.pipeline_mode<synchronous>, transform_indices = @transform_2, window_bounds = array<i64: 32, 128>}, {pipeline_mode = #tpu.pipeline_mode<synchronous>, transform_indices = @transform_3, window_bounds = array<i64: 32, 32>}, {transform_indices = @transform_4, window_bounds = array<i64: 1, 32, 1>}, {pipeline_mode = #tpu.pipeline_mode<synchronous>, transform_indices = @transform_5, window_bounds = array<i64: 32, 1>}, {pipeline_mode = #tpu.pipeline_mode<synchronous>, transform_indices = @transform_6, window_bounds = array<i64: 32, 1>}, {transform_indices = @transform_7, window_bounds = array<i64: 1, 32, 16>}, {transform_indices = @transform_8, window_bounds = array<i64: 1, 1, 16>}]} {
    %c0 = arith.constant 0 : index
    %c0_0 = arith.constant 0 : index
    %0 = vector.load %arg4[%c0, %c0_0] : memref<32x128xbf16, #tpu.memory_space<vmem>>, vector<32x128xbf16>
    %c0_1 = arith.constant 0 : index
    %c0_2 = arith.constant 0 : index
    %c0_3 = arith.constant 0 : index
    %1 = vector.load %arg2[%c0_1, %c0_2, %c0_3] : memref<1x128x16xbf16, #tpu.memory_space<vmem>>, vector<1x128x16xbf16>
    %2 = vector.shape_cast %1 : vector<1x128x16xbf16> to vector<128x16xbf16>
    %cst = arith.constant dense<0.000000e+00> : vector<32x16xf32>
    %3 = tpu.matmul %0, %2, %cst {dimension_numbers = #tpu.dot_dimension_numbers<[1], [0], [0], [1], [0, 0, 1, 1], [], []>} : vector<32x128xbf16>, vector<128x16xbf16>, vector<32x16xf32> -> vector<32x16xf32>
    %c0_4 = arith.constant 0 : index
    %c0_5 = arith.constant 0 : index
    %4 = vector.load %arg5[%c0_4, %c0_5] : memref<32x32xbf16, #tpu.memory_space<vmem>>, vector<32x32xbf16>
    %c0_6 = arith.constant 0 : index
    %c0_7 = arith.constant 0 : index
    %c0_8 = arith.constant 0 : index
    %5 = vector.load %arg3[%c0_6, %c0_7, %c0_8] : memref<1x32x16xbf16, #tpu.memory_space<vmem>>, vector<1x32x16xbf16>
    %6 = vector.shape_cast %5 : vector<1x32x16xbf16> to vector<32x16xbf16>
    %cst_9 = arith.constant dense<0.000000e+00> : vector<32x16xf32>
    %7 = tpu.matmul %4, %6, %cst_9 {dimension_numbers = #tpu.dot_dimension_numbers<[1], [0], [0], [1], [0, 0, 1, 1], [], []>} : vector<32x32xbf16>, vector<32x16xbf16>, vector<32x16xf32> -> vector<32x16xf32>
    %c0_10 = arith.constant 0 : index
    %c0_11 = arith.constant 0 : index
    %8 = vector.load %arg7[%c0_10, %c0_11] : memref<32x1xf32, #tpu.memory_space<vmem>>, vector<32x1xf32>
    %9 = vector.broadcast %8 : vector<32x1xf32> to vector<32x16xf32>
    %10 = arith.addf %7, %9 : vector<32x16xf32>
    %11 = arith.addf %10, %3 : vector<32x16xf32>
    %c0_12 = arith.constant 0 : index
    %c0_13 = arith.constant 0 : index
    %c0_14 = arith.constant 0 : index
    %12 = vector.load %arg6[%c0_12, %c0_13, %c0_14] : memref<1x32x1xf32, #tpu.memory_space<vmem>>, vector<1x32x1xf32>
    %13 = vector.shape_cast %12 : vector<1x32x1xf32> to vector<32x1xf32>
    %14 = vector.broadcast %13 : vector<32x1xf32> to vector<32x16xf32>
    %15 = arith.addf %11, %14 : vector<32x16xf32>
    %16 = math.tanh %15 : vector<32x16xf32>
    %c0_15 = arith.constant 0 : index
    %c0_16 = arith.constant 0 : index
    %17 = vector.load %arg8[%c0_15, %c0_16] : memref<32x1xf32, #tpu.memory_space<vmem>>, vector<32x1xf32>
    %18 = vector.broadcast %17 : vector<32x1xf32> to vector<32x16xf32>
    %19 = arith.mulf %16, %18 : vector<32x16xf32>
    %cst_17 = arith.constant dense<0.000000e+00> : vector<16xf32>
    %20 = vector.multi_reduction <add>, %19, %cst_17 [0] : vector<32x16xf32> to vector<16xf32>
    %21 = vector.shape_cast %20 : vector<16xf32> to vector<1x16xf32>
    %c0_18 = arith.constant 0 : index
    %c0_19 = arith.constant 0 : index
    %c0_20 = arith.constant 0 : index
    %22 = vector.load %arg9[%c0_18, %c0_19, %c0_20] : memref<1x32x16xf32, #tpu.memory_space<vmem>>, vector<1x32x16xf32>
    %23 = vector.shape_cast %22 : vector<1x32x16xf32> to vector<32x16xf32>
    %24 = vector.shape_cast %10 : vector<32x16xf32> to vector<1x32x16xf32>
    tpu.vector_store %arg9[%c0_18, %c0_19, %c0_20], %24 {strides = array<i32>} : memref<1x32x16xf32, #tpu.memory_space<vmem>>, vector<1x32x16xf32>,
    %c0_21 = arith.constant 0 : index
    %c0_22 = arith.constant 0 : index
    %c0_23 = arith.constant 0 : index
    %25 = vector.load %arg10[%c0_21, %c0_22, %c0_23] : memref<1x1x16xf32, #tpu.memory_space<vmem>>, vector<1x1x16xf32>
    %26 = vector.shape_cast %25 : vector<1x1x16xf32> to vector<1x16xf32>
    %27 = vector.shape_cast %21 : vector<1x16xf32> to vector<1x1x16xf32>
    tpu.vector_store %arg10[%c0_21, %c0_22, %c0_23], %27 {strides = array<i32>} : memref<1x1x16xf32, #tpu.memory_space<vmem>>, vector<1x1x16xf32>,
    return
  }
  func.func @transform_0(%arg0: i32, %arg1: i32) -> (i32, i32, i32) {
    %c0_i32 = arith.constant 0 : i32
    %c0_i32_0 = arith.constant 0 : i32
    return %arg0, %c0_i32, %arg1 : i32, i32, i32
  }
  func.func @transform_1(%arg0: i32, %arg1: i32) -> (i32, i32, i32) {
    %c0_i32 = arith.constant 0 : i32
    %c0_i32_0 = arith.constant 0 : i32
    return %arg0, %c0_i32, %arg1 : i32, i32, i32
  }
  func.func @transform_2(%arg0: i32, %arg1: i32) -> (i32, i32) {
    %c0_i32 = arith.constant 0 : i32
    %c0_i32_0 = arith.constant 0 : i32
    %c0_i32_1 = arith.constant 0 : i32
    return %c0_i32, %c0_i32_0 : i32, i32
  }
  func.func @transform_3(%arg0: i32, %arg1: i32) -> (i32, i32) {
    %c0_i32 = arith.constant 0 : i32
    %c0_i32_0 = arith.constant 0 : i32
    %c0_i32_1 = arith.constant 0 : i32
    return %c0_i32, %c0_i32_0 : i32, i32
  }
  func.func @transform_4(%arg0: i32, %arg1: i32) -> (i32, i32, i32) {
    %c0_i32 = arith.constant 0 : i32
    %c0_i32_0 = arith.constant 0 : i32
    %c0_i32_1 = arith.constant 0 : i32
    return %arg0, %c0_i32, %c0_i32_0 : i32, i32, i32
  }
  func.func @transform_5(%arg0: i32, %arg1: i32) -> (i32, i32) {
    %c0_i32 = arith.constant 0 : i32
    %c0_i32_0 = arith.constant 0 : i32
    %c0_i32_1 = arith.constant 0 : i32
    return %c0_i32, %c0_i32_0 : i32, i32
  }
  func.func @transform_6(%arg0: i32, %arg1: i32) -> (i32, i32) {
    %c0_i32 = arith.constant 0 : i32
    %c0_i32_0 = arith.constant 0 : i32
    %c0_i32_1 = arith.constant 0 : i32
    return %c0_i32, %c0_i32_0 : i32, i32
  }
  func.func @transform_7(%arg0: i32, %arg1: i32) -> (i32, i32, i32) {
    %c0_i32 = arith.constant 0 : i32
    %c0_i32_0 = arith.constant 0 : i32
    return %arg0, %c0_i32, %arg1 : i32, i32, i32
  }
  func.func @transform_8(%arg0: i32, %arg1: i32) -> (i32, i32, i32) {
    %c0_i32 = arith.constant 0 : i32
    %c0_i32_0 = arith.constant 0 : i32
    return %arg0, %c0_i32, %arg1 : i32, i32, i32
  }
}

</mosaic_0001>

<bundles_post_ra>
// kernel: tpu_custom_call.1
= control target key start
LH: loop header
LB: loop body
LE: loop exit
PB: predicated region body
PF: predicated region fallthrough
CT: control target
= control target key end

     0   :  { %14 = vsyncpa [#allocation3], 0  ;;  %s1288_s0 = inlined_call_operand.vmem [shape: bf16[2,128,16], index: 0, kind: input, shape index: {}]   ;;  %s1289_s1 = inlined_call_operand.vmem [shape: bf16[2,32,16], index: 1, kind: input, shape index: {}]   ;;  %s1290_s2 = inlined_call_operand.vmem [shape: bf16[32,128], index: 2, kind: input, shape index: {}]   ;;  %s1291_s3 = inlined_call_operand.vmem [shape: bf16[32,32], index: 3, kind: input, shape index: {}]   ;;  %s1292_s4 = inlined_call_operand.vmem [shape: f32[2,32,1], index: 4, kind: input, shape index: {}]   ;;  %s1293_s5 = inlined_call_operand.vmem [shape: f32[32,1], index: 5, kind: input, shape index: {}]   ;;  %s1294_s6 = inlined_call_operand.vmem [shape: f32[32,1], index: 6, kind: input, shape index: {}]   ;;  %s1295_s7 = inlined_call_operand.vmem [shape: f32[2,32,16], index: 7, kind: output, shape index: {0}]   ;;  %s1296_s8 = inlined_call_operand.hbm [shape: f32[2,1,16], index: 8, kind: output, shape index: {1}]  }
   0x1   :  { %16 = vsyncpa [#allocation3 + $0x1], 0  ;;  %s1117_s27 = smov 0   ;;  %s1119_s28 = smov 0  }
   0x2   :  { %s1121_s29 = smov 0   ;;  %s1123_s30 = smov 0  }
   0x3   :  { %s1125_s9 = smov 0   ;;  %s1127_s10 = smov 0  }
   0x4 LB: > { %s825_s11 = sadd.s32 4294967295, %s1069_s10   ;;  %s826_s12 = sadd.s32 4294967294, %s1069_s10   ;;  %s1069_s10 = sphi %s1127_s10, %s22_s10   ;;  %s1065_s9 = sphi %s1125_s9, %s1306_s9   ;;  %s1061_s30 = sphi %s1123_s30, %s1305_s30   ;;  %s1057_s29 = sphi %s1121_s29, %s1304_s29   ;;  %s1053_s28 = sphi %s1119_s28, %s1303_s28   ;;  %s1049_s27 = sphi %s1117_s27, %s1302_s27  }
   0x5   : > { %s34_s13 = sadd.s32 1, %s1065_s9  ;;  %s237_s14 = sadd.s32 1, %s1057_s29 }
   0x6   : > { %p36_p0 = scmp.ge.s32.totalorder %s34_s13, 2  ;;  %p247_p1 = scmp.ne.s32.totalorder %s1057_s29, %s1053_s28 }
   0x7   : > { %p248_p2 = scmp.eq.s32.totalorder %s825_s11, 1  ;;  %p253_p3 = scmp.ne.s32.totalorder %s1053_s28, %s1049_s27 }
   0x8   : > { %s1308_s13 = smov (%p36_p0, %s34_s13), 0  ;;  %p254_p5 = scmp.eq.s32.totalorder %s826_s12, 1 }
   0x9   : > { %1298 = sst [smem:[#allocation5_spill]] %s1308_s13  ;;  %p1157_p4 = por %p248_p2, %p247_p1 }
   0xa   : > { %s232_s16 = ssub.s32 %s1065_s9, %s1308_s13  ;;  %p829_p6 = scmp.ge.s32.totalorder %s1069_s10, 1 }
   0xb   : > { %p235_p7 = scmp.eq.s32.totalorder %s232_s16, 0  ;;  %p1164_p8 = por %p254_p5, %p253_p3 }
   0xc   : > { %p314_p9 = scmp.lt.s32.totalorder %s1069_s10, 3 }
   0xd   : > { %s1170_s18 = scalar_select %p235_p7, %s1057_s29, %s237_s14  }
   0xe   : > { %p315_p10 = pnand %p829_p6, %p314_p9 }
   0xf   : > { %p371_p11 = scmp.lt.s32.totalorder (!%p315_p10), %s1061_s30, 1  ;;  %s1011_s22 = scalar_lea.hbm (!%p315_p10), %s1296_s8, 2 }
  0x10   : > { %318 = sbr.rel (%p315_p10) target bundleno = 228 (0xe4), region = 48 }
  0x15   : > { %v508_v0 = vld [vmem:[%s1293_s5] sm:$0xff]  ;;  %v510_v1 = vld [vmem:[%s1293_s5 + $0x10] sm:$0xff]  ;;  %v1071_v2 = vmov 0   ;;  %s1180_s23 = scalar_select %p371_p11, %s1061_s30, 1  ;;  %v509_v5 = vld [vmem:[%s1293_s5 + $0x8] sm:$0xff]  ;;  %vm554_vm0 = vcmask 261120  }
  0x16   : > { %980 = vset.pattern.permute.xlu0 %v1071_v2  ;;  %981 = vset.pattern.permute.xlu1 %v1071_v2  ;;  %v511_v6 = vld [vmem:[%s1293_s5 + $0x18] sm:$0xff]  ;;  %v912_v10 = vld [vmem:[%s1291_s3] sm:$0xff]  ;;  %v617_v17 = vld [vmem:[%s1294_s6 + $0x8] sm:$0xff]  ;;  %vm644_vm1 = vcmask 130048   ;;  %vm662_vm2 = vcmask 122880  }
  0x17   : > { %514 = vperm.xlu0 %980, %v508_v0   ;;  %524 = vperm.xlu1 %981, %v510_v1   ;;  %s898_s24 = sshll.u32 %s1180_s23, 6  ;;  %s899_s25 = sshll.u32 %s1180_s23, 4  ;;  %v618_v18 = vld [vmem:[%s1294_s6 + $0x10] sm:$0xff]  ;;  %v616_v20 = vld [vmem:[%s1294_s6] sm:$0xff]  ;;  %v913_v21 = vld [vmem:[%s1291_s3 + $0x8] sm:$0xff] }
  0x18   : > { %982 = vset.pattern.permute.xlu2 %v1071_v2  ;;  %s1187_s12 = scalar_lea.vmem %s1288_s0, %s898_s24  ;;  %s386_s19 = scalar_lea.vmem %s1289_s1, %s899_s25  ;;  %v619_v24 = vld [vmem:[%s1294_s6 + $0x18] sm:$0xff]  ;;  %v902_v25 = vld [vmem:[%s1290_s2] sm:$0xff]  ;;  %v903_v26 = vld [vmem:[%s1290_s2 + $0x8] sm:$0xff] }
  0x19   : > { %v911_v3 = vld [vmem:[%s1187_s12 + $0x38] sm:$0xff]  ;;  %v915_v4 = vld [vmem:[%s386_s19 + $0x8] sm:$0xff]  ;;  %s900_s26 = sshll.u32 %s1180_s23, 5  ;;  %v910_v7 = vld [vmem:[%s1187_s12 + $0x30] sm:$0xff]  ;;  %s369_s23 = sand.u32 1, %s1053_s28  }
  0x1a   : > { %481 = vmatpush.bf16.msra.mxu0 %v911_v3  ;;  %916 = vmatpush.bf16.msra.mxu2 %v911_v3  ;;  %v914_v8 = vld [vmem:[%s386_s19] sm:$0xff]  ;;  %s391_s11 = scalar_lea.vmem %s1292_s4, %s900_s26  ;;  %v909_v11 = vld [vmem:[%s1187_s12 + $0x28] sm:$0xff]  ;;  %v907_v16 = vld [vmem:[%s1187_s12 + $0x18] sm:$0xff]  ;;  %s399_s24 = scalar_lea.vmem %s1295_s7, %s900_s26 }
  0x1b   : > { %567 = vmatpush.bf16.msra.mxu1 %v915_v4  ;;  %v584_v9 = vld [vmem:[%s391_s11] sm:$0xff]  ;;  %v586_v12 = vld [vmem:[%s391_s11 + $0x10] sm:$0xff]  ;;  %v587_v13 = vld [vmem:[%s391_s11 + $0x18] sm:$0xff]  ;;  %s370_s14 = scalar_lea.vmem [#allocation2], %s369_s23  ;;  %s673_s19 = scalar_lea.sflag [#allocation3], %s369_s23 }
  0x1c   : > { %590 = vperm.xlu2 %982, %v584_v9   ;;  %v908_v14 = vld [vmem:[%s1187_s12 + $0x20] sm:$0xff]  ;;  %v585_v15 = vld [vmem:[%s391_s11 + $0x8] sm:$0xff]  ;;  %v906_v19 = vld [vmem:[%s1187_s12 + $0x10] sm:$0xff]  ;;  %s685_s11 = scalar_lea.hbm %s1296_s8, %s1061_s30  ;;  %s687_s13 = sshll.u32 %s370_s14, 4  ;;  %s688_s13 = int_to_ptr.vmem [resolvable:$true] %s687_s13 }
  0x1d   : > { %v905_v22 = vld [vmem:[%s1187_s12 + $0x8] sm:$0xff]  ;;  %v904_v23 = vld [vmem:[%s1187_s12] sm:$0xff]  ;;  %s689_s16 = sshll.u32 %s685_s11, 4  ;;  %s690_s16 = int_to_ptr.hbm [resolvable:$true] %s689_s16 }
  0x1e   : > { %482 = vmatpush.bf16.msra.mxu0 %v910_v7  ;;  %917 = vmatpush.bf16.msra.mxu2 %v910_v7  ;;  %s1005_s20 = sshra.s32 %s690_s16, 4  ;;  %s1006_s20 = int_to_ptr.hbm [resolvable:$true] %s1005_s20 }
  0x1f   : > { %519 = vperm.xlu0 %980, %v509_v5   ;;  %529 = vperm.xlu1 %981, %v511_v6   ;;  %s1007_s21 = scalar_lea.hbm %s1006_s20, 1  ;;  %p1012_p1 = scmp.lt.s32.totalorder %s1006_s20, %s1296_s8 }
  0x20   : > { %568 = vmatpush.bf16.msra.mxu1 %v914_v8  ;;  %p1008_p12 = scmp.ne.s32.totalorder %s1006_s20, %s1007_s21  ;;  %p1013_p2 = scmp.lt.s32.totalorder %s1011_s22, %s1007_s21 }
  0x22   : > { %483 = vmatpush.bf16.msra.mxu0 %v909_v11  ;;  %918 = vmatpush.bf16.msra.mxu2 %v909_v11  ;;  %p1009_p13 = pnand %p1008_p12, %p1157_p4  ;;  %p1014_p3 = por %p1013_p2, %p1012_p1 }
  0x23   : > { %894 = vmatmul.msk.bf16.vlgmr.msra.gmra.mxu1 %vm554_vm0, %v912_v10 }
  0x24   : > { %595 = vperm.xlu2 %982, %v585_v15   ;;  %p1010_p0 = pneg %p1009_p13 }
  0x26   : > { %484 = vmatpush.bf16.msra.mxu0 %v908_v14  ;;  %919 = vmatpush.bf16.msra.mxu2 %v908_v14  ;;  %p1015_p5 = pnand %p1014_p3, %p1010_p0 }
  0x27   : > { %600 = vperm.xlu0 %980, %v586_v12   ;;  %605 = vperm.xlu1 %981, %v587_v13  }
  0x2a   : > { %485 = vmatpush.bf16.msra.mxu0 %v907_v16  ;;  %920 = vmatpush.bf16.msra.mxu2 %v907_v16 }
  0x2c   : > { %622 = vperm.xlu2 %982, %v616_v20  }
  0x2e   : > { %486 = vmatpush.bf16.msra.mxu0 %v906_v19  ;;  %921 = vmatpush.bf16.msra.mxu2 %v906_v19 }
  0x2f   : > { %627 = vperm.xlu0 %980, %v617_v17   ;;  %632 = vperm.xlu1 %981, %v618_v18  }
  0x32   : > { %487 = vmatpush.bf16.msra.mxu0 %v905_v22  ;;  %922 = vmatpush.bf16.msra.mxu2 %v905_v22 }
  0x33   : > { %895 = vmatmul.msk.bf16.gmra.mxu1 %vm554_vm0, %v913_v21 }
  0x34   : > { %637 = vperm.xlu2 %982, %v619_v24  }
  0x36   : > { %488 = vmatpush.bf16.msra.mxu0 %v904_v23  ;;  %923 = vmatpush.bf16.msra.mxu2 %v904_v23 }
  0x39   : > { %489 = vmatmul.bf16.vlgmr.msra.gmra.mxu0 %v902_v25  ;;  %494 = vmatmul.bf16.vlgmr.msra.gmra.mxu2 %v903_v26 }
  0x76   : > { %v591_v36 = vpop.permute.xlu2 %590 }
  0x7e   : > { %v596_v42 = vpop.permute.xlu2 %595 }
  0x86   : > { %v623_v54 = vpop.permute.xlu2 %622 }
  0x89   : > { %v515_v27 = vpop.permute.xlu0 %514  ;;  %v525_v33 = vpop.permute.xlu1 %524 }
  0x8e   : > { %v638_v4 = vpop.permute.xlu2 %637 }
  0x91   : > { %v520_v30 = vpop.permute.xlu0 %519  ;;  %v530_v38 = vpop.permute.xlu1 %529 }
  0x99   : > { %v601_v47 = vpop.permute.xlu0 %600  ;;  %v606_v51 = vpop.permute.xlu1 %605 }
  0xa0   : > { %v570_v28 = vpop.f32.mrf.mxu1 }
  0xa1   : > { %v571_v29 = vadd.f32 %v570_v28, %v515_v27  ;;  %v628_v58 = vpop.permute.xlu0 %627  ;;  %v633_v62 = vpop.permute.xlu1 %632 }
  0xa3   : > { %658 = vst.msk [vmem:[%s399_s24] sm:$0xff] %vm644_vm1, %v571_v29 }
  0xa8   : > { %v572_v31 = vpop.f32.mrf.mxu1 }
  0xa9   : > { %v573_v32 = vadd.f32 %v572_v31, %v520_v30 }
  0xab   : > { %659 = vst.msk [vmem:[%s399_s24 + $0x8] sm:$0xff] %vm644_vm1, %v573_v32 }
  0xb0   : > { %v575_v34 = vpop.f32.mrf.mxu1 }
  0xb1   : > { %v576_v35 = vadd.f32 %v575_v34, %v525_v33 }
  0xb3   : > { %660 = vst.msk [vmem:[%s399_s24 + $0x10] sm:$0xff] %vm644_vm1, %v576_v35 }
  0xb6   : > { %v490_v37 = vpop.f32.mrf.mxu0 }
  0xb7   : > { %v580_v40 = vadd.f32 %v571_v29, %v490_v37 }
  0xb8   : > { %v577_v39 = vpop.f32.mrf.mxu1 }
  0xb9   : > { %v578_v41 = vadd.f32 %v577_v39, %v530_v38  ;;  %v608_v43 = vadd.f32 %v591_v36, %v580_v40 }
  0xbb   : > { %661 = vst.msk [vmem:[%s399_s24 + $0x18] sm:$0xff] %vm644_vm1, %v578_v41  ;;  %983 = vtanh.f32 %v608_v43 }
  0xbc   : > { %v495_v44 = vpop.f32.mrf.mxu2 }
  0xbd   : > { %v582_v45 = vadd.f32 %v576_v35, %v495_v44 }
  0xbe   : > { %v492_v46 = vpop.f32.mrf.mxu0 }
  0xbf   : > { %v581_v48 = vadd.f32 %v573_v32, %v492_v46  ;;  %v610_v49 = vadd.f32 %v601_v47, %v582_v45 }
  0xc1   : > { %v609_v50 = vadd.f32 %v596_v42, %v581_v48  ;;  %v984_v53 = vpop.eup %983 }
  0xc2   : > { %v640_v59 = vmul.f32 %v984_v53, %v623_v54 }
  0xc3   : > { %985 = vtanh.f32 %v609_v50 }
  0xc4   : > { %987 = vtanh.f32 %v610_v49  ;;  %v497_v52 = vpop.f32.mrf.mxu2  ;;  %v645_v0 = vsel %vm644_vm1, %v640_v59, 0.0 }
  0xc5   : > { %v583_v55 = vadd.f32 %v578_v41, %v497_v52 }
  0xc7   : > { %v611_v56 = vadd.f32 %v606_v51, %v583_v55 }
  0xc9   : > { %v986_v57 = vpop.eup %985  ;;  %989 = vtanh.f32 %v611_v56 }
  0xca   : > { %v988_v60 = vpop.eup %987  ;;  %v641_v61 = vmul.f32 %v986_v57, %v628_v58 }
  0xcb   : > { %v642_v1 = vmul.f32 %v988_v60, %v633_v62 }
  0xcc   : > { %v646_v63 = vsel %vm644_vm1, %v641_v61, 0.0 }
  0xcd   : > { %v647_v2 = vadd.f32 %v646_v63, %v645_v0  ;;  %v648_v5 = vsel %vm644_vm1, %v642_v1, 0.0 }
  0xcf   : > { %v990_v3 = vpop.eup %989  ;;  %v649_v7 = vadd.f32 %v648_v5, %v647_v2 }
  0xd0   : > { %v643_v6 = vmul.f32 %v990_v3, %v638_v4 }
  0xd2   : > { %v650_v8 = vsel %vm644_vm1, %v643_v6, 0.0 }
  0xd3   : > { %v651_v9 = vadd.f32 %v650_v8, %v649_v7 }
  0xd5   : > { %v652_v10 = vrot.slane %v651_v9, 4 }
  0xd7   : > { %v653_v11 = vadd.f32 %v652_v10, %v651_v9 }
  0xd9   : > { %v654_v12 = vrot.slane %v653_v11, 2 }
  0xdb   : > { %v655_v13 = vadd.f32 %v654_v12, %v653_v11 }
  0xdd   : > { %v656_v14 = vrot.slane %v655_v13, 1 }
  0xdf   : > { %v657_v15 = vadd.f32 %v656_v14, %v655_v13 }
  0xe1   : > { %663 = vst.msk [vmem:[%s370_s14] sm:$0x1] %vm662_vm2, %v657_v15 }
  0xe2   : > { %1018 = shalt.err (!%p1015_p5)
}
  0xe3   : > { %924 = dma.vmem_to_hbm [thread:$0]  (%p1157_p4), %s688_s13, 16, %s690_s16, %s673_s19  }
  0xe4 PF: > { %p930_p6 = scmp.ge.s32.totalorder %s1069_s10, 2  ;;  %s712_s23 = sand.u32 1, %s1049_s27  }
  0xe5   : > { %s713_s25 = scalar_lea.sflag [#allocation3], %s712_s23 }
  0xe6   : > { %p927_p7 = pnand %p930_p6, %p1164_p8 }
  0xe8   : > { %p928_p9 = pneg %p927_p7 }
  0xea   : > { %1044 = dma.done.wait (%p928_p9), %s713_s25, 16  }
  0xeb   : > { %1046 = vsyncadd (%p928_p9), %s713_s25, 4294967280  ;;  %s22_s10 = sadd.s32 1, %s1069_s10   ;;  %s1301_s15 = sld [smem:[#allocation5_spill]] }
  0xec   : > { %p19_p10 = scmp.ge.s32.totalorder %s22_s10, 4   ;;  %s1302_s27 = smov %s1053_s28 }
  0xed   : > { %s1303_s28 = smov %s1057_s29  ;;  %s1304_s29 = smov %s1170_s18 }
  0xee   : > { %s1305_s30 = smov %s1065_s9  ;;  %21 = sbr.rel (!%p19_p10) target bundleno = 4 (0x4), region = 101 }
  0xf1   : > { %s1306_s9 = smov %s1301_s15 }
  0xf3   :  { %718 = vsyncpa [#allocation3], 1 }
  0xf4   :  { %720 = vsyncpa [#allocation3 + $0x1], 1 }

</bundles_post_ra>
